<compile_context>
chip_gen: v5e
topology: v5e:2x2
jax: 0.10.0
libtpu: 0.0.40
codegen_flags: <defaults>
</compile_context>

<pallas_src>
import functools

import jax
import jax.numpy as jnp
from jax import lax
from jax.experimental import pallas as pl
from jax.experimental.pallas import tpu as pltpu

LANE = 128     # lane width: pad last dims to a multiple of this
SUBLANE = 8    # f32 sublane width


def _round_up(x, m):
    return ((x + m - 1) // m) * m


def resnet_kernel(x_ref, w_in_ref, b_in_ref, w_h_ref, b_h_ref,
                  w_out_ref, b_out_ref, o_ref):
    """One batch tile of the fused ResNet MLP forward pass.

    Matmuls run on the MXU with f32 accumulation; the activation is carried in
    vregs across layers (no per-layer VMEM scratch round-trip); the layer loop
    is fully unrolled so the scheduler can interleave adjacent layers.
    """
    mxu_dtype = w_in_ref.dtype

    # Input projection + ReLU (bias / relu stay f32 on the VPU).
    h = jnp.dot(x_ref[...], w_in_ref[...], preferred_element_type=jnp.float32)
    h = jnp.maximum(h + b_in_ref[...], 0.0)

    num_layers = w_h_ref.shape[0]

    # Residual blocks: h = relu(h @ W_l + b_l + h), carried in the loop carry.
    def body(l, h):
        y = jnp.dot(h.astype(mxu_dtype), w_h_ref[l],
                    preferred_element_type=jnp.float32)
        return jnp.maximum(y + b_h_ref[l] + h, 0.0)

    h = lax.fori_loop(0, num_layers, body, h, unroll=True)

    # Output projection (no activation); lane-dense store (last dim padded to 128).
    o = jnp.dot(h.astype(mxu_dtype), w_out_ref[...],
                preferred_element_type=jnp.float32)
    o_ref[...] = (o + b_out_ref[...]).astype(o_ref.dtype)


@functools.partial(jax.jit, static_argnames=("compute_dtype",))
def resnet_forward(x, w_in, b_in, w_h, b_h, w_out, b_out,
                   compute_dtype=jnp.float32):
    B, K = x.shape
    H = w_in.shape[1]
    L = w_h.shape[0]
    O = w_out.shape[1]

    # Lane-dense padding of all feature dims.
    K_pad = _round_up(K, LANE)
    H_pad = _round_up(H, LANE)
    O_pad = _round_up(O, LANE)

    # Batch tile: MXU row width for large batches; otherwise the whole
    # (sublane-aligned) batch in a single tile.
    TM = 128 if B >= 128 else _round_up(B, SUBLANE)
    B_pad = _round_up(B, TM)

    f32 = jnp.float32
    xp = jnp.pad(x, ((0, B_pad - B), (0, K_pad - K))).astype(compute_dtype)
    w_in_p = jnp.pad(w_in, ((0, K_pad - K), (0, H_pad - H))).astype(compute_dtype)
    b_in_p = jnp.pad(b_in, ((0, 0), (0, H_pad - H))).astype(f32)
    w_h_p = jnp.pad(w_h, ((0, 0), (0, H_pad - H), (0, H_pad - H))).astype(compute_dtype)
    b_h_p = jnp.pad(b_h, ((0, 0), (0, 0), (0, H_pad - H))).astype(f32)
    w_out_p = jnp.pad(w_out, ((0, H_pad - H), (0, O_pad - O))).astype(compute_dtype)
    b_out_p = jnp.pad(b_out, ((0, 0), (0, O_pad - O))).astype(f32)

    # Explicit VMEM budget (default scoped limit is well below physical VMEM).
    itemsize = jnp.dtype(compute_dtype).itemsize
    weight_bytes = (K_pad * H_pad + L * H_pad * H_pad + H_pad * O_pad) * itemsize
    act_bytes = TM * (K_pad * itemsize + (H_pad + O_pad) * 4)
    bias_bytes = ((L + 1) * H_pad + O_pad) * 4
    vmem_limit = int(min(2 * (weight_bytes + act_bytes + bias_bytes) + (8 << 20),
                         100 << 20))
    # NOTE: for very large (L, H, H) stacks (esp. on v7x with 64 MiB VMEM) the
    # resident weight stack should be replaced by a streamed layer grid axis
    # (BlockSpec((1, H, H), lambda b, l: (l, 0, 0)) marked "arbitrary"); at the
    # sizes used here whole-stack residency is both simpler and faster.

    const2 = lambda i: (0, 0)
    const3 = lambda i: (0, 0, 0)

    out_padded = pl.pallas_call(
        resnet_kernel,
        out_shape=jax.ShapeDtypeStruct((B_pad, O_pad), jnp.float32),
        grid_spec=pltpu.PrefetchScalarGridSpec(
            num_scalar_prefetch=0,
            grid=(B_pad // TM,),
            in_specs=[
                pl.BlockSpec((TM, K_pad), lambda i: (i, 0)),        # x (batch-tiled)
                pl.BlockSpec((K_pad, H_pad), const2),               # w_in (resident)
                pl.BlockSpec((1, H_pad), const2),                   # b_in
                pl.BlockSpec((L, H_pad, H_pad), const3),            # w_h stack
                pl.BlockSpec((L, 1, H_pad), const3),                # b_h stack
                pl.BlockSpec((H_pad, O_pad), const2),               # w_out
                pl.BlockSpec((1, O_pad), const2),                   # b_out
            ],
            out_specs=pl.BlockSpec((TM, O_pad), lambda i: (i, 0)),
        ),
        compiler_params=pltpu.CompilerParams(
            dimension_semantics=("parallel",),   # megacore-shard the batch axis
            vmem_limit_bytes=vmem_limit,
        ),
    )(xp, w_in_p, b_in_p, w_h_p, b_h_p, w_out_p, b_out_p)

    return out_padded[:B, :O]


def resnet_reference(x, w_in, b_in, w_h, b_h, w_out, b_out):
    h = jnp.maximum(x @ w_in + b_in, 0.0)
    for l in range(w_h.shape[0]):
        h = jnp.maximum(h @ w_h[l] + b_h[l] + h, 0.0)
    return h @ w_out + b_out


if __name__ == "__main__":
    # Small, module-consistent shapes.
    batch = 8
    input_size = 16
    hidden_size = 32
    num_hidden_layers = 3
    output_size = 8

    key = jax.random.PRNGKey(0)
    ks = jax.random.split(key, 8)

    # Deterministic synthetic parameters (shapes follow nn.Linear fan-in/fan-out).
    # Weights stored as (fan_in, fan_out) i.e. already transposed vs. torch.
    scale_in = 1.0 / jnp.sqrt(input_size)
    scale_h = 1.0 / jnp.sqrt(hidden_size)

    x = jax.random.normal(ks[0], (batch, input_size), dtype=jnp.float32)
    w_in = jax.random.uniform(ks[1], (input_size, hidden_size), jnp.float32,
                              -scale_in, scale_in)
    b_in = jax.random.uniform(ks[2], (1, hidden_size), jnp.float32,
                              -scale_in, scale_in)
    w_h = jax.random.uniform(ks[3], (num_hidden_layers, hidden_size, hidden_size),
                             jnp.float32, -scale_h, scale_h)
    b_h = jax.random.uniform(ks[4], (num_hidden_layers, 1, hidden_size),
                             jnp.float32, -scale_h, scale_h)
    w_out = jax.random.uniform(ks[5], (hidden_size, output_size), jnp.float32,
                               -scale_h, scale_h)
    b_out = jax.random.uniform(ks[6], (1, output_size), jnp.float32,
                               -scale_h, scale_h)

    ref = resnet_reference(x, w_in, b_in, w_h, b_h, w_out, b_out)

    # f32 MXU path — numerically matches the reference.
    out_f32 = jax.block_until_ready(
        resnet_forward(x, w_in, b_in, w_h, b_h, w_out, b_out,
                       compute_dtype=jnp.float32))
    assert out_f32.shape == (batch, output_size)
    assert jnp.allclose(out_f32, ref, atol=1e-5, rtol=1e-5), "f32 mismatch vs reference"

    # bf16 MXU-input path (f32 accumulation) for v6e/v7x throughput — loose tolerance.
    out_bf16 = jax.block_until_ready(
        resnet_forward(x, w_in, b_in, w_h, b_h, w_out, b_out,
                       compute_dtype=jnp.bfloat16))
    assert out_bf16.shape == (batch, output_size)
    assert bool(jnp.all(jnp.isfinite(out_bf16)))
    assert jnp.allclose(out_bf16, ref, atol=2e-1, rtol=2e-1), "bf16 mismatch vs reference"

    print("KERNEL_OK")
</pallas_src>

<mosaic_0001>
module attributes {stable_mosaic.version = 11 : i64} {
  func.func @resnet_kernel(%arg0: i32, %arg1: memref<8x128xf32, #tpu.memory_space<vmem>>, %arg2: memref<128x128xf32, #tpu.memory_space<vmem>>, %arg3: memref<1x128xf32, #tpu.memory_space<vmem>>, %arg4: memref<3x128x128xf32, #tpu.memory_space<vmem>>, %arg5: memref<3x1x128xf32, #tpu.memory_space<vmem>>, %arg6: memref<128x128xf32, #tpu.memory_space<vmem>>, %arg7: memref<1x128xf32, #tpu.memory_space<vmem>>, %arg8: memref<8x128xf32, #tpu.memory_space<vmem>>) attributes {dimension_semantics = [#tpu.dimension_semantics<parallel>], iteration_bounds = array<i64: 1>, scalar_prefetch = 0 : i64, scratch_operands = 0 : i64, tpu.core_type = #tpu.core_type<tc>, window_params = [{transform_indices = @transform_0, window_bounds = array<i64: 8, 128>}, {pipeline_mode = #tpu.pipeline_mode<synchronous>, transform_indices = @transform_1, window_bounds = array<i64: 128, 128>}, {pipeline_mode = #tpu.pipeline_mode<synchronous>, transform_indices = @transform_2, window_bounds = array<i64: 1, 128>}, {pipeline_mode = #tpu.pipeline_mode<synchronous>, transform_indices = @transform_3, window_bounds = array<i64: 3, 128, 128>}, {pipeline_mode = #tpu.pipeline_mode<synchronous>, transform_indices = @transform_4, window_bounds = array<i64: 3, 1, 128>}, {pipeline_mode = #tpu.pipeline_mode<synchronous>, transform_indices = @transform_5, window_bounds = array<i64: 128, 128>}, {pipeline_mode = #tpu.pipeline_mode<synchronous>, transform_indices = @transform_6, window_bounds = array<i64: 1, 128>}, {transform_indices = @transform_7, window_bounds = array<i64: 8, 128>}]} {
    %c0 = arith.constant 0 : index
    %c0_0 = arith.constant 0 : index
    %0 = vector.load %arg1[%c0, %c0_0] : memref<8x128xf32, #tpu.memory_space<vmem>>, vector<8x128xf32>
    %c0_1 = arith.constant 0 : index
    %c0_2 = arith.constant 0 : index
    %1 = vector.load %arg2[%c0_1, %c0_2] : memref<128x128xf32, #tpu.memory_space<vmem>>, vector<128x128xf32>
    %cst = arith.constant dense<0.000000e+00> : vector<8x128xf32>
    %2 = tpu.matmul %0, %1, %cst {dimension_numbers = #tpu.dot_dimension_numbers<[1], [0], [0], [1], [0, 0, 1, 1], [], []>} : vector<8x128xf32>, vector<128x128xf32>, vector<8x128xf32> -> vector<8x128xf32>
    %c0_3 = arith.constant 0 : index
    %c0_4 = arith.constant 0 : index
    %3 = vector.load %arg3[%c0_3, %c0_4] : memref<1x128xf32, #tpu.memory_space<vmem>>, vector<1x128xf32>
    %4 = vector.broadcast %3 : vector<1x128xf32> to vector<8x128xf32>
    %5 = arith.addf %2, %4 : vector<8x128xf32>
    %cst_5 = arith.constant 0.000000e+00 : f32
    %6 = vector.broadcast %cst_5 : f32 to vector<8x128xf32>
    %7 = arith.maximumf %5, %6 : vector<8x128xf32>
    %c0_i32 = arith.constant 0 : i32
    %8 = arith.index_cast %c0_i32 : i32 to index
    %c0_6 = arith.constant 0 : index
    %c0_7 = arith.constant 0 : index
    %9 = vector.load %arg4[%8, %c0_6, %c0_7] : memref<3x128x128xf32, #tpu.memory_space<vmem>>, vector<1x128x128xf32>
    %10 = vector.shape_cast %9 : vector<1x128x128xf32> to vector<128x128xf32>
    %cst_8 = arith.constant dense<0.000000e+00> : vector<8x128xf32>
    %11 = tpu.matmul %7, %10, %cst_8 {dimension_numbers = #tpu.dot_dimension_numbers<[1], [0], [0], [1], [0, 0, 1, 1], [], []>} : vector<8x128xf32>, vector<128x128xf32>, vector<8x128xf32> -> vector<8x128xf32>
    %12 = arith.index_cast %c0_i32 : i32 to index
    %c0_9 = arith.constant 0 : index
    %c0_10 = arith.constant 0 : index
    %13 = vector.load %arg5[%12, %c0_9, %c0_10] : memref<3x1x128xf32, #tpu.memory_space<vmem>>, vector<1x1x128xf32>
    %14 = vector.shape_cast %13 : vector<1x1x128xf32> to vector<1x128xf32>
    %15 = vector.broadcast %14 : vector<1x128xf32> to vector<8x128xf32>
    %16 = arith.addf %11, %15 : vector<8x128xf32>
    %17 = arith.addf %16, %7 : vector<8x128xf32>
    %cst_11 = arith.constant 0.000000e+00 : f32
    %18 = vector.broadcast %cst_11 : f32 to vector<8x128xf32>
    %19 = arith.maximumf %17, %18 : vector<8x128xf32>
    %c1_i32 = arith.constant 1 : i32
    %20 = arith.index_cast %c1_i32 : i32 to index
    %c0_12 = arith.constant 0 : index
    %c0_13 = arith.constant 0 : index
    %21 = vector.load %arg4[%20, %c0_12, %c0_13] : memref<3x128x128xf32, #tpu.memory_space<vmem>>, vector<1x128x128xf32>
    %22 = vector.shape_cast %21 : vector<1x128x128xf32> to vector<128x128xf32>
    %cst_14 = arith.constant dense<0.000000e+00> : vector<8x128xf32>
    %23 = tpu.matmul %19, %22, %cst_14 {dimension_numbers = #tpu.dot_dimension_numbers<[1], [0], [0], [1], [0, 0, 1, 1], [], []>} : vector<8x128xf32>, vector<128x128xf32>, vector<8x128xf32> -> vector<8x128xf32>
    %24 = arith.index_cast %c1_i32 : i32 to index
    %c0_15 = arith.constant 0 : index
    %c0_16 = arith.constant 0 : index
    %25 = vector.load %arg5[%24, %c0_15, %c0_16] : memref<3x1x128xf32, #tpu.memory_space<vmem>>, vector<1x1x128xf32>
    %26 = vector.shape_cast %25 : vector<1x1x128xf32> to vector<1x128xf32>
    %27 = vector.broadcast %26 : vector<1x128xf32> to vector<8x128xf32>
    %28 = arith.addf %23, %27 : vector<8x128xf32>
    %29 = arith.addf %28, %19 : vector<8x128xf32>
    %cst_17 = arith.constant 0.000000e+00 : f32
    %30 = vector.broadcast %cst_17 : f32 to vector<8x128xf32>
    %31 = arith.maximumf %29, %30 : vector<8x128xf32>
    %c2_i32 = arith.constant 2 : i32
    %32 = arith.index_cast %c2_i32 : i32 to index
    %c0_18 = arith.constant 0 : index
    %c0_19 = arith.constant 0 : index
    %33 = vector.load %arg4[%32, %c0_18, %c0_19] : memref<3x128x128xf32, #tpu.memory_space<vmem>>, vector<1x128x128xf32>
    %34 = vector.shape_cast %33 : vector<1x128x128xf32> to vector<128x128xf32>
    %cst_20 = arith.constant dense<0.000000e+00> : vector<8x128xf32>
    %35 = tpu.matmul %31, %34, %cst_20 {dimension_numbers = #tpu.dot_dimension_numbers<[1], [0], [0], [1], [0, 0, 1, 1], [], []>} : vector<8x128xf32>, vector<128x128xf32>, vector<8x128xf32> -> vector<8x128xf32>
    %36 = arith.index_cast %c2_i32 : i32 to index
    %c0_21 = arith.constant 0 : index
    %c0_22 = arith.constant 0 : index
    %37 = vector.load %arg5[%36, %c0_21, %c0_22] : memref<3x1x128xf32, #tpu.memory_space<vmem>>, vector<1x1x128xf32>
    %38 = vector.shape_cast %37 : vector<1x1x128xf32> to vector<1x128xf32>
    %39 = vector.broadcast %38 : vector<1x128xf32> to vector<8x128xf32>
    %40 = arith.addf %35, %39 : vector<8x128xf32>
    %41 = arith.addf %40, %31 : vector<8x128xf32>
    %cst_23 = arith.constant 0.000000e+00 : f32
    %42 = vector.broadcast %cst_23 : f32 to vector<8x128xf32>
    %43 = arith.maximumf %41, %42 : vector<8x128xf32>
    %c3_i32 = arith.constant 3 : i32
    %c0_24 = arith.constant 0 : index
    %c0_25 = arith.constant 0 : index
    %44 = vector.load %arg6[%c0_24, %c0_25] : memref<128x128xf32, #tpu.memory_space<vmem>>, vector<128x128xf32>
    %cst_26 = arith.constant dense<0.000000e+00> : vector<8x128xf32>
    %45 = tpu.matmul %43, %44, %cst_26 {dimension_numbers = #tpu.dot_dimension_numbers<[1], [0], [0], [1], [0, 0, 1, 1], [], []>} : vector<8x128xf32>, vector<128x128xf32>, vector<8x128xf32> -> vector<8x128xf32>
    %c0_27 = arith.constant 0 : index
    %c0_28 = arith.constant 0 : index
    %46 = vector.load %arg7[%c0_27, %c0_28] : memref<1x128xf32, #tpu.memory_space<vmem>>, vector<1x128xf32>
    %47 = vector.broadcast %46 : vector<1x128xf32> to vector<8x128xf32>
    %48 = arith.addf %45, %47 : vector<8x128xf32>
    %c0_29 = arith.constant 0 : index
    %c0_30 = arith.constant 0 : index
    %49 = vector.load %arg8[%c0_29, %c0_30] : memref<8x128xf32, #tpu.memory_space<vmem>>, vector<8x128xf32>
    tpu.vector_store %arg8[%c0_29, %c0_30], %48 {strides = array<i32>} : memref<8x128xf32, #tpu.memory_space<vmem>>, vector<8x128xf32>,
    return
  }
  func.func @transform_0(%arg0: i32) -> (i32, i32) {
    %c0_i32 = arith.constant 0 : i32
    %c0_i32_0 = arith.constant 0 : i32
    return %arg0, %c0_i32 : i32, i32
  }
  func.func @transform_1(%arg0: i32) -> (i32, i32) {
    %c0_i32 = arith.constant 0 : i32
    %c0_i32_0 = arith.constant 0 : i32
    %c0_i32_1 = arith.constant 0 : i32
    return %c0_i32, %c0_i32_0 : i32, i32
  }
  func.func @transform_2(%arg0: i32) -> (i32, i32) {
    %c0_i32 = arith.constant 0 : i32
    %c0_i32_0 = arith.constant 0 : i32
    %c0_i32_1 = arith.constant 0 : i32
    return %c0_i32, %c0_i32_0 : i32, i32
  }
  func.func @transform_3(%arg0: i32) -> (i32, i32, i32) {
    %c0_i32 = arith.constant 0 : i32
    %c0_i32_0 = arith.constant 0 : i32
    %c0_i32_1 = arith.constant 0 : i32
    %c0_i32_2 = arith.constant 0 : i32
    return %c0_i32, %c0_i32_0, %c0_i32_1 : i32, i32, i32
  }
  func.func @transform_4(%arg0: i32) -> (i32, i32, i32) {
    %c0_i32 = arith.constant 0 : i32
    %c0_i32_0 = arith.constant 0 : i32
    %c0_i32_1 = arith.constant 0 : i32
    %c0_i32_2 = arith.constant 0 : i32
    return %c0_i32, %c0_i32_0, %c0_i32_1 : i32, i32, i32
  }
  func.func @transform_5(%arg0: i32) -> (i32, i32) {
    %c0_i32 = arith.constant 0 : i32
    %c0_i32_0 = arith.constant 0 : i32
    %c0_i32_1 = arith.constant 0 : i32
    return %c0_i32, %c0_i32_0 : i32, i32
  }
  func.func @transform_6(%arg0: i32) -> (i32, i32) {
    %c0_i32 = arith.constant 0 : i32
    %c0_i32_0 = arith.constant 0 : i32
    %c0_i32_1 = arith.constant 0 : i32
    return %c0_i32, %c0_i32_0 : i32, i32
  }
  func.func @transform_7(%arg0: i32) -> (i32, i32) {
    %c0_i32 = arith.constant 0 : i32
    %c0_i32_0 = arith.constant 0 : i32
    return %arg0, %c0_i32 : i32, i32
  }
}

</mosaic_0001>

<bundles_post_ra>
// kernel: resnet_forward.1
= control target key start
LH: loop header
LB: loop body
LE: loop exit
PB: predicated region body
PF: predicated region fallthrough
CT: control target
= control target key end

     0   :  { %s624_s0 = inlined_call_operand.vmem [shape: f32[8,128], index: 0, kind: input, shape index: {}]   ;;  %s625_s1 = inlined_call_operand.vmem [shape: f32[128,128], index: 1, kind: input, shape index: {}]   ;;  %s626_s2 = inlined_call_operand.vmem [shape: f32[1,128], index: 2, kind: input, shape index: {}]   ;;  %s627_s3 = inlined_call_operand.vmem [shape: f32[3,128,128], index: 3, kind: input, shape index: {}]   ;;  %s628_s4 = inlined_call_operand.vmem [shape: f32[3,1,128], index: 4, kind: input, shape index: {}]   ;;  %s629_s5 = inlined_call_operand.vmem [shape: f32[128,128], index: 5, kind: input, shape index: {}]   ;;  %s630_s6 = inlined_call_operand.vmem [shape: f32[1,128], index: 6, kind: input, shape index: {}]   ;;  %s631_s7 = inlined_call_operand.hbm [shape: f32[8,128], index: 7, kind: output, shape index: {}]  }
   0x1   :  { %v43_v0 = vld [vmem:[%s625_s1 + $0x78] sm:$0xff]  ;;  %v42_v1 = vld [vmem:[%s625_s1 + $0x70] sm:$0xff]  ;;  %v41_v2 = vld [vmem:[%s625_s1 + $0x68] sm:$0xff] }
   0x2   :  { %48 = vmatpush.msra.mxu0 %v43_v0  ;;  %v40_v3 = vld [vmem:[%s625_s1 + $0x60] sm:$0xff]  ;;  %v84_v4 = vld [vmem:[%s627_s3 + $0x78] sm:$0xff]  ;;  %v83_v6 = vld [vmem:[%s627_s3 + $0x70] sm:$0xff] }
   0x3   :  { %v39_v5 = vld [vmem:[%s625_s1 + $0x58] sm:$0xff]  ;;  %89 = vmatpush.msra.mxu1 %v84_v4  ;;  %v82_v7 = vld [vmem:[%s627_s3 + $0x68] sm:$0xff]  ;;  %v38_v8 = vld [vmem:[%s625_s1 + $0x50] sm:$0xff] }
   0x4   :  { %49 = vmatpush.msra.mxu0 %v42_v1  ;;  %v37_v9 = vld [vmem:[%s625_s1 + $0x48] sm:$0xff]  ;;  %v81_v10 = vld [vmem:[%s627_s3 + $0x60] sm:$0xff]  ;;  %v80_v11 = vld [vmem:[%s627_s3 + $0x58] sm:$0xff] }
   0x5   :  { %90 = vmatpush.msra.mxu1 %v83_v6  ;;  %v36_v12 = vld [vmem:[%s625_s1 + $0x40] sm:$0xff] }
   0x6   :  { %50 = vmatpush.msra.mxu0 %v41_v2 }
   0x7   :  { %91 = vmatpush.msra.mxu1 %v82_v7 }
   0x8   :  { %51 = vmatpush.msra.mxu0 %v40_v3 }
   0x9   :  { %92 = vmatpush.msra.mxu1 %v81_v10 }
   0xa   :  { %52 = vmatpush.msra.mxu0 %v39_v5 }
   0xc   :  { %53 = vmatpush.msra.mxu0 %v38_v8 }
   0xd   :  { %12 = vsyncpa [#allocation3], 0  ;;  %v79_v13 = vld [vmem:[%s627_s3 + $0x50] sm:$0xff]  ;;  %v35_v14 = vld [vmem:[%s625_s1 + $0x38] sm:$0xff]  ;;  %93 = vmatpush.msra.mxu1 %v80_v11 }
   0xe   :  { %54 = vmatpush.msra.mxu0 %v37_v9  ;;  %v78_v15 = vld [vmem:[%s627_s3 + $0x48] sm:$0xff]  ;;  %v34_v16 = vld [vmem:[%s625_s1 + $0x30] sm:$0xff]  ;;  %v77_v17 = vld [vmem:[%s627_s3 + $0x40] sm:$0xff] }
   0xf   :  { %94 = vmatpush.msra.mxu1 %v79_v13  ;;  %v33_v18 = vld [vmem:[%s625_s1 + $0x28] sm:$0xff]  ;;  %v76_v19 = vld [vmem:[%s627_s3 + $0x38] sm:$0xff]  ;;  %v32_v20 = vld [vmem:[%s625_s1 + $0x20] sm:$0xff] }
  0x10   :  { %55 = vmatpush.msra.mxu0 %v36_v12  ;;  %v75_v21 = vld [vmem:[%s627_s3 + $0x30] sm:$0xff]  ;;  %v31_v22 = vld [vmem:[%s625_s1 + $0x18] sm:$0xff]  ;;  %v74_v23 = vld [vmem:[%s627_s3 + $0x28] sm:$0xff] }
  0x11   :  { %95 = vmatpush.msra.mxu1 %v78_v15  ;;  %v30_v24 = vld [vmem:[%s625_s1 + $0x10] sm:$0xff]  ;;  %v73_v25 = vld [vmem:[%s627_s3 + $0x20] sm:$0xff]  ;;  %v29_v26 = vld [vmem:[%s625_s1 + $0x8] sm:$0xff] }
  0x12   :  { %56 = vmatpush.msra.mxu0 %v35_v14  ;;  %v72_v27 = vld [vmem:[%s627_s3 + $0x18] sm:$0xff]  ;;  %v28_v28 = vld [vmem:[%s625_s1] sm:$0xff]  ;;  %v71_v30 = vld [vmem:[%s627_s3 + $0x10] sm:$0xff] }
  0x13   :  { %96 = vmatpush.msra.mxu1 %v77_v17  ;;  %v27_v29 = vld [vmem:[%s624_s0] sm:$0xff]  ;;  %v70_v31 = vld [vmem:[%s627_s3 + $0x8] sm:$0xff]  ;;  %v271_v33 = vld [vmem:[%s627_s3 + $0xf8] sm:$0xff]  ;;  %s322_s0 = smov [#allocation2]  }
  0x14   :  { %57 = vmatpush.msra.mxu0 %v34_v16  ;;  %v69_v32 = vld [vmem:[%s627_s3] sm:$0xff]  ;;  %v270_v34 = vld [vmem:[%s627_s3 + $0xf0] sm:$0xff]  ;;  %133 = vmatpush.msra.mxu2 %v271_v33  ;;  %v269_v35 = vld [vmem:[%s627_s3 + $0xe8] sm:$0xff]  ;;  %s245_s21 = sshll.u32 %s322_s0, 4  ;;  %s246_s21 = int_to_ptr.vmem [resolvable:$true] %s245_s21 }
  0x15   :  { %97 = vmatpush.msra.mxu1 %v76_v19  ;;  %v268_v36 = vld [vmem:[%s627_s3 + $0xe0] sm:$0xff]  ;;  %v267_v37 = vld [vmem:[%s627_s3 + $0xd8] sm:$0xff]  ;;  %v266_v38 = vld [vmem:[%s627_s3 + $0xd0] sm:$0xff] }
  0x16   :  { %58 = vmatpush.msra.mxu0 %v33_v18  ;;  %134 = vmatpush.msra.mxu2 %v270_v34  ;;  %v265_v39 = vld [vmem:[%s627_s3 + $0xc8] sm:$0xff]  ;;  %v264_v40 = vld [vmem:[%s627_s3 + $0xc0] sm:$0xff]  ;;  %v263_v41 = vld [vmem:[%s627_s3 + $0xb8] sm:$0xff] }
  0x17   :  { %98 = vmatpush.msra.mxu1 %v75_v21  ;;  %v262_v42 = vld [vmem:[%s627_s3 + $0xb0] sm:$0xff]  ;;  %v261_v43 = vld [vmem:[%s627_s3 + $0xa8] sm:$0xff]  ;;  %v260_v44 = vld [vmem:[%s627_s3 + $0xa0] sm:$0xff] }
  0x18   :  { %59 = vmatpush.msra.mxu0 %v32_v20  ;;  %135 = vmatpush.msra.mxu2 %v269_v35  ;;  %v291_v45 = vld [vmem:[%s626_s2] ss:$0 sm:$0xff]  ;;  %v259_v49 = vld [vmem:[%s627_s3 + $0x98] sm:$0xff]  ;;  %v258_v50 = vld [vmem:[%s627_s3 + $0x90] sm:$0xff] }
  0x19   :  { %99 = vmatpush.msra.mxu1 %v74_v23  ;;  %v257_v51 = vld [vmem:[%s627_s3 + $0x88] sm:$0xff]  ;;  %v256_v52 = vld [vmem:[%s627_s3 + $0x80] sm:$0xff]  ;;  %v288_v53 = vld [vmem:[%s627_s3 + $0x178] sm:$0xff] }
  0x1a   :  { %60 = vmatpush.msra.mxu0 %v31_v22  ;;  %136 = vmatpush.msra.mxu2 %v268_v36  ;;  %v287_v54 = vld [vmem:[%s627_s3 + $0x170] sm:$0xff]  ;;  %v286_v55 = vld [vmem:[%s627_s3 + $0x168] sm:$0xff]  ;;  %v285_v56 = vld [vmem:[%s627_s3 + $0x160] sm:$0xff] }
  0x1b   :  { %100 = vmatpush.msra.mxu1 %v73_v25  ;;  %177 = vmatpush.msra.mxu3 %v288_v53  ;;  %v284_v57 = vld [vmem:[%s627_s3 + $0x158] sm:$0xff]  ;;  %v283_v58 = vld [vmem:[%s627_s3 + $0x150] sm:$0xff]  ;;  %v282_v59 = vld [vmem:[%s627_s3 + $0x148] sm:$0xff] }
  0x1c   :  { %61 = vmatpush.msra.mxu0 %v30_v24  ;;  %137 = vmatpush.msra.mxu2 %v267_v37  ;;  %v281_v60 = vld [vmem:[%s627_s3 + $0x140] sm:$0xff]  ;;  %v280_v61 = vld [vmem:[%s627_s3 + $0x138] sm:$0xff]  ;;  %v279_v62 = vld [vmem:[%s627_s3 + $0x130] sm:$0xff] }
  0x1d   :  { %101 = vmatpush.msra.mxu1 %v72_v27  ;;  %178 = vmatpush.msra.mxu3 %v287_v54  ;;  %v278_v63 = vld [vmem:[%s627_s3 + $0x128] sm:$0xff]  ;;  %v277_v0 = vld [vmem:[%s627_s3 + $0x120] sm:$0xff]  ;;  %v276_v6 = vld [vmem:[%s627_s3 + $0x118] sm:$0xff] }
  0x1e   :  { %62 = vmatpush.msra.mxu0 %v29_v26  ;;  %138 = vmatpush.msra.mxu2 %v266_v38  ;;  %v292_v1 = vld [vmem:[%s628_s4] ss:$0 sm:$0xff]  ;;  %v275_v7 = vld [vmem:[%s627_s3 + $0x110] sm:$0xff]  ;;  %v274_v8 = vld [vmem:[%s627_s3 + $0x108] sm:$0xff] }
  0x1f   :  { %102 = vmatpush.msra.mxu1 %v71_v30  ;;  %179 = vmatpush.msra.mxu3 %v286_v55  ;;  %v273_v9 = vld [vmem:[%s627_s3 + $0x100] sm:$0xff]  ;;  %v214_v10 = vld [vmem:[%s629_s5 + $0x78] sm:$0xff]  ;;  %v213_v11 = vld [vmem:[%s629_s5 + $0x70] sm:$0xff] }
  0x20   :  { %63 = vmatpush.msra.mxu0 %v28_v28  ;;  %139 = vmatpush.msra.mxu2 %v265_v39  ;;  %v212_v12 = vld [vmem:[%s629_s5 + $0x68] sm:$0xff]  ;;  %v211_v13 = vld [vmem:[%s629_s5 + $0x60] sm:$0xff]  ;;  %v210_v14 = vld [vmem:[%s629_s5 + $0x58] sm:$0xff] }
  0x21   :  { %64 = vmatmul.f32.vlgmr.msra.gmra.mxu0 %v27_v29  ;;  %103 = vmatpush.msra.mxu1 %v70_v31  ;;  %v209_v15 = vld [vmem:[%s629_s5 + $0x50] sm:$0xff]  ;;  %v208_v16 = vld [vmem:[%s629_s5 + $0x48] sm:$0xff]  ;;  %v207_v17 = vld [vmem:[%s629_s5 + $0x40] sm:$0xff] }
  0x22   :  { %140 = vmatpush.msra.mxu2 %v264_v40  ;;  %180 = vmatpush.msra.mxu3 %v285_v56  ;;  %v206_v18 = vld [vmem:[%s629_s5 + $0x38] sm:$0xff]  ;;  %v205_v19 = vld [vmem:[%s629_s5 + $0x30] sm:$0xff]  ;;  %v204_v20 = vld [vmem:[%s629_s5 + $0x28] sm:$0xff] }
  0x23   :  { %104 = vmatpush.msra.mxu1 %v69_v32  ;;  %219 = vmatpush.msrb.mxu0 %v214_v10  ;;  %v203_v21 = vld [vmem:[%s629_s5 + $0x20] sm:$0xff]  ;;  %v202_v27 = vld [vmem:[%s629_s5 + $0x18] sm:$0xff]  ;;  %v201_v28 = vld [vmem:[%s629_s5 + $0x10] sm:$0xff] }
  0x24   :  { %141 = vmatpush.msra.mxu2 %v263_v41  ;;  %181 = vmatpush.msra.mxu3 %v284_v57  ;;  %v293_v22 = vld [vmem:[%s628_s4 + $0x1] ss:$0 sm:$0xff]  ;;  %v200_v29 = vld [vmem:[%s629_s5 + $0x8] sm:$0xff]  ;;  %v294_v31 = vld [vmem:[%s628_s4 + $0x2] ss:$0 sm:$0xff] }
  0x25   :  { %220 = vmatpush.msrb.mxu0 %v213_v11  ;;  %v199_v30 = vld [vmem:[%s629_s5] sm:$0xff]  ;;  %s247_s5 = sshll.u32 %s631_s7, 4  ;;  %s248_s5 = int_to_ptr.hbm [resolvable:$true] %s247_s5 }
  0x26   :  { %142 = vmatpush.msra.mxu2 %v262_v42  ;;  %182 = vmatpush.msra.mxu3 %v283_v58  ;;  %v295_v36 = vld [vmem:[%s630_s6] ss:$0 sm:$0xff] }
  0x27   :  { %221 = vmatpush.msrb.mxu0 %v212_v12 }
  0x28   :  { %143 = vmatpush.msra.mxu2 %v261_v43  ;;  %183 = vmatpush.msra.mxu3 %v282_v59 }
  0x29   :  { %222 = vmatpush.msrb.mxu0 %v211_v13 }
  0x2a   :  { %144 = vmatpush.msra.mxu2 %v260_v44  ;;  %184 = vmatpush.msra.mxu3 %v281_v60 }
  0x2b   :  { %223 = vmatpush.msrb.mxu0 %v210_v14 }
  0x2c   :  { %145 = vmatpush.msra.mxu2 %v259_v49  ;;  %185 = vmatpush.msra.mxu3 %v280_v61 }
  0x2d   :  { %224 = vmatpush.msrb.mxu0 %v209_v15 }
  0x2e   :  { %146 = vmatpush.msra.mxu2 %v258_v50  ;;  %186 = vmatpush.msra.mxu3 %v279_v62 }
  0x2f   :  { %225 = vmatpush.msrb.mxu0 %v208_v16 }
  0x30   :  { %147 = vmatpush.msra.mxu2 %v257_v51  ;;  %187 = vmatpush.msra.mxu3 %v278_v63 }
  0x31   :  { %226 = vmatpush.msrb.mxu0 %v207_v17 }
  0x32   :  { %148 = vmatpush.msra.mxu2 %v256_v52  ;;  %188 = vmatpush.msra.mxu3 %v277_v0 }
  0x33   :  { %227 = vmatpush.msrb.mxu0 %v206_v18 }
  0x34   :  { %189 = vmatpush.msra.mxu3 %v276_v6 }
  0x35   :  { %228 = vmatpush.msrb.mxu0 %v205_v19 }
  0x36   :  { %190 = vmatpush.msra.mxu3 %v275_v7 }
  0x37   :  { %229 = vmatpush.msrb.mxu0 %v204_v20 }
  0x38   :  { %191 = vmatpush.msra.mxu3 %v274_v8 }
  0x39   :  { %230 = vmatpush.msrb.mxu0 %v203_v21 }
  0x3a   :  { %192 = vmatpush.msra.mxu3 %v273_v9 }
  0x3b   :  { %231 = vmatpush.msrb.mxu0 %v202_v27 }
  0x3d   :  { %232 = vmatpush.msrb.mxu0 %v201_v28 }
  0x3f   :  { %233 = vmatpush.msrb.mxu0 %v200_v29 }
  0x41   :  { %234 = vmatpush.msrb.mxu0 %v199_v30 }
  0x9e   :  { %v65_v46 = vpop.f32.mrf.mxu0 }
  0x9f   :  { %v66_v47 = vadd.f32 %v291_v45, %v65_v46 }
  0xa1   :  { %v68_v48 = vmax.f32 %v66_v47, 0.0 }
  0xa3   :  { %105 = vmatmul.f32.vlgmr.msra.gmra.mxu1 %v68_v48 }
 0x120   :  { %v106_v2 = vpop.f32.mrf.mxu1 }
 0x121   :  { %v107_v3 = vadd.f32 %v292_v1, %v106_v2 }
 0x123   :  { %v109_v4 = vadd.f32 %v107_v3, %v68_v48 }
 0x125   :  { %v110_v5 = vmax.f32 %v109_v4, 0.0 }
 0x127   :  { %149 = vmatmul.f32.vlgmr.msra.gmra.mxu2 %v110_v5 }
 0x1aa   :  { %v150_v23 = vpop.f32.mrf.mxu2 }
 0x1ab   :  { %v151_v24 = vadd.f32 %v293_v22, %v150_v23 }
 0x1ad   :  { %v153_v25 = vadd.f32 %v151_v24, %v110_v5 }
 0x1af   :  { %v154_v26 = vmax.f32 %v153_v25, 0.0 }
 0x1b1   :  { %193 = vmatmul.f32.vlgmr.msra.gmra.mxu3 %v154_v26 }
 0x234   :  { %v194_v32 = vpop.f32.mrf.mxu3 }
 0x235   :  { %v195_v33 = vadd.f32 %v294_v31, %v194_v32 }
 0x237   :  { %v197_v34 = vadd.f32 %v195_v33, %v154_v26 }
 0x239   :  { %v198_v35 = vmax.f32 %v197_v34, 0.0 }
 0x23b   :  { %235 = vmatmul.f32.vlgmr.msrb.gmra.mxu0 %v198_v35 }
 0x2b8   :  { %v236_v37 = vpop.f32.mrf.mxu0 }
 0x2b9   :  { %v237_v38 = vadd.f32 %v295_v36, %v236_v37 }
 0x2bb   :  { %239 = vst [vmem:[#allocation2] sm:$0xff] %v237_v38 }
 0x2bc   :  { %250 = dma.vmem_to_hbm [thread:$0]  %s246_s21, 128, %s248_s5, [#allocation3]  }
 0x2bd   :  { %320 = dma.done.wait [#allocation3], 128  }
 0x2be   :  { %321 = vsyncadd [#allocation3], 4294967168 }
 0x2bf   :  { %255 = vsyncpa [#allocation3], 1 }

</bundles_post_ra>
